<compile_context>
chip_gen: v7x
topology: tpu7x:2x2x1
jax: 0.10.0
libtpu: 0.0.40
codegen_flags: <defaults>
</compile_context>

<pallas_src>
import functools

import jax
import jax.numpy as jnp
from jax.experimental import pallas as pl
from jax.experimental.pallas import tpu as pltpu

_HIDDEN = 64            # logical hidden width (PyTorch model)
_HIDDEN_PAD = 128       # lane-dense hidden width used inside the kernel
_LANE = 128
_SUBLANE = 8
_TM_MAX = 2048          # max batch-tile rows (sweep point; ~1.3 MiB VMEM at bf16)
_ONE_STEP_MAX = 256     # at/below this many rows a single grid step is cheapest
_IO_DTYPE = jnp.bfloat16  # HBM dtype for x / weights / logits (f32 accumulation inside)

# bf16 packs two rows per sublane; keep batch tiles aligned to whole packed
# sublanes on every generation (16 rows for bf16, 8 for f32).
_ROW_ALIGN = _SUBLANE * (4 // jnp.dtype(_IO_DTYPE).itemsize)


def _round_up(x, m):
    return (x + m - 1) // m * m


def _pick_batch_tile(batch):
    """Batch-tile rows (multiple of _ROW_ALIGN). Big tiles amortize the ~0.35us
    per-step grid overhead; above _ONE_STEP_MAX force >= 2 steps so the
    'parallel' batch axis can shard across v7x's two TensorCores."""
    b = _round_up(batch, _ROW_ALIGN)
    if b <= _ONE_STEP_MAX:
        return b
    n_steps = max(2, -(-b // _TM_MAX))
    return _round_up(-(-b // n_steps), _ROW_ALIGN)


def _vmem_limit_bytes():
    """Per-generation scoped-VMEM budget (~3/4 of physical). v5e's 16 MiB default
    would otherwise cap large batch tiles; v7x only has 64 MiB physical."""
    try:
        cap = getattr(pltpu.get_tpu_info(), "vmem_capacity_bytes", None)
    except Exception:
        cap = None
    if not cap:
        cap = 64 << 20          # conservative fallback (v7x physical VMEM)
    return int(cap) * 3 // 4


def _mlp_kernel(x_ref, w1_ref, b12_ref, w2_ref, w3_ref, b3_ref, o_ref):
    """One batch tile: relu(x@w1+b1) -> relu(.@w2+b2) -> .@w3+b3.
    bf16 MXU inputs, f32 accumulation; bias-add / ReLU on the f32 accumulator
    (v5e's VPU has no bf16), bf16 lane-dense store."""
    f32 = jnp.float32
    b12 = b12_ref[...].astype(f32)                      # (2, 128): row 0 = b1, row 1 = b2

    h = jnp.dot(x_ref[...], w1_ref[...], preferred_element_type=f32)
    h = jnp.maximum(h + b12[0:1, :], 0.0)
    # dropout(p=0.2): identity at inference time.
    # TODO(synk): training-mode dropout (pltpu.prng_random_bits mask) not emitted.
    h = jnp.dot(h.astype(w2_ref.dtype), w2_ref[...], preferred_element_type=f32)
    h = jnp.maximum(h + b12[1:2, :], 0.0)
    out = jnp.dot(h.astype(w3_ref.dtype), w3_ref[...], preferred_element_type=f32)
    out = out + b3_ref[...].astype(f32)
    o_ref[...] = out.astype(o_ref.dtype)


def _pad_params(params, num_classes, dtype):
    """Zero-pad hidden (64->128) and class (->128k) dims (exact: padded hidden
    columns stay 0 through ReLU because bias pads are 0; padded class logits are
    sliced off), pack b1/b2 into one (2,128) block, cast to the HBM/MXU dtype."""
    ncls_pad = _round_up(num_classes, _LANE)
    as_row = lambda b: jnp.asarray(b).reshape(1, -1)     # accepts (out,) or (1, out)
    hp = _HIDDEN_PAD - _HIDDEN
    w1 = jnp.pad(params["w1"], ((0, 0), (0, hp)))
    w2 = jnp.pad(params["w2"], ((0, hp), (0, hp)))
    w3 = jnp.pad(params["w3"], ((0, hp), (0, ncls_pad - num_classes)))
    b1 = jnp.pad(as_row(params["b1"]), ((0, 0), (0, hp)))
    b2 = jnp.pad(as_row(params["b2"]), ((0, 0), (0, hp)))
    b12 = jnp.concatenate([b1, b2], axis=0)              # (2, 128): one DMA stream
    b3 = jnp.pad(as_row(params["b3"]), ((0, 0), (0, ncls_pad - num_classes)))
    cast = lambda a: a.astype(dtype)
    return cast(w1), cast(b12), cast(w2), cast(w3), cast(b3), ncls_pad


@functools.partial(jax.jit, static_argnames=("num_classes",))
def yoga_classifier_forward(x, params, *, num_classes):
    """x: (B, input_length) float; params: dict of (in,out) weights + (out,) or
    (1,out) biases. Returns f32 logits of shape (B, num_classes)."""
    B, K = x.shape
    w1, b12, w2, w3, b3, ncls_pad = _pad_params(params, num_classes, _IO_DTYPE)

    tm = _pick_batch_tile(B)
    b_pad = _round_up(B, tm)
    nb = b_pad // tm

    xk = x.astype(_IO_DTYPE)
    if b_pad != B:
        xk = jnp.pad(xk, ((0, b_pad - B), (0, 0)))

    isz = jnp.dtype(_IO_DTYPE).itemsize
    flops = 2 * b_pad * (K * _HIDDEN_PAD + _HIDDEN_PAD * _HIDDEN_PAD
                         + _HIDDEN_PAD * ncls_pad)
    bytes_accessed = isz * (b_pad * K + b_pad * ncls_pad
                            + K * _HIDDEN_PAD + _HIDDEN_PAD * _HIDDEN_PAD
                            + _HIDDEN_PAD * ncls_pad + 2 * _HIDDEN_PAD + ncls_pad)

    const = lambda i: (0, 0)          # weights/biases: resident in VMEM across steps
    batched = lambda i: (i, 0)        # x / out: tiled over the batch grid axis

    out = pl.pallas_call(
        _mlp_kernel,
        out_shape=jax.ShapeDtypeStruct((b_pad, ncls_pad), _IO_DTYPE),
        grid_spec=pltpu.PrefetchScalarGridSpec(
            num_scalar_prefetch=0,
            grid=(nb,),
            in_specs=[
                pl.BlockSpec((tm, K), batched),                    # x
                pl.BlockSpec((K, _HIDDEN_PAD), const),             # w1
                pl.BlockSpec((2, _HIDDEN_PAD), const),             # b1|b2 packed
                pl.BlockSpec((_HIDDEN_PAD, _HIDDEN_PAD), const),   # w2
                pl.BlockSpec((_HIDDEN_PAD, ncls_pad), const),      # w3
                pl.BlockSpec((1, ncls_pad), const),                # b3
            ],
            out_specs=pl.BlockSpec((tm, ncls_pad), batched),
        ),
        compiler_params=pltpu.CompilerParams(
            dimension_semantics=("parallel",),       # shard batch steps across TCs
            vmem_limit_bytes=_vmem_limit_bytes(),
        ),
        cost_estimate=pl.CostEstimate(
            flops=flops, transcendentals=0, bytes_accessed=bytes_accessed),
    )(xk, w1, b12, w2, w3, b3)

    # Drop batch padding / padded class columns so padded logits never leak to a
    # downstream argmax/softmax; the slice is tiny relative to the bf16 kernel
    # writeback. The f32 cast restores PyTorch's output dtype and fuses with it.
    return out[:B, :num_classes].astype(jnp.float32)


def init_params(key, input_length, num_classes):
    """Deterministic init mimicking torch.nn.Linear (uniform +-1/sqrt(fan_in))."""
    def linear(k, fan_in, fan_out):
        kw, kb = jax.random.split(k)
        bound = 1.0 / jnp.sqrt(fan_in)
        w = jax.random.uniform(kw, (fan_in, fan_out), jnp.float32, -bound, bound)
        b = jax.random.uniform(kb, (1, fan_out), jnp.float32, -bound, bound)
        return w, b

    k1, k2, k3 = jax.random.split(key, 3)
    w1, b1 = linear(k1, input_length, _HIDDEN)
    w2, b2 = linear(k2, _HIDDEN, _HIDDEN)
    w3, b3 = linear(k3, _HIDDEN, num_classes)
    return {"w1": w1, "b1": b1, "w2": w2, "b2": b2, "w3": w3, "b3": b3}


def _reference_forward(x, params):
    """Plain-JAX reference with the same bf16 rounding of x / weights as the
    kernel path (f32 accumulation), eval-mode dropout = identity."""
    q = lambda a: a.astype(_IO_DTYPE).astype(jnp.float32)
    h = jnp.maximum(q(x) @ q(params["w1"]) + q(params["b1"]), 0.0)
    h = jnp.maximum(q(h) @ q(params["w2"]) + q(params["b2"]), 0.0)
    return q(h) @ q(params["w3"]) + q(params["b3"])


if __name__ == "__main__":
    key = jax.random.PRNGKey(0)
    k_params, k_x = jax.random.split(key)

    batch = 8
    input_length = 32   # e.g. flattened pose keypoints
    num_classes = 10

    params = init_params(k_params, input_length, num_classes)
    x = jax.random.normal(k_x, (batch, input_length), jnp.float32)

    out = yoga_classifier_forward(x, params, num_classes=num_classes)
    jax.block_until_ready(out)
    assert out.shape == (batch, num_classes)
    ref = _reference_forward(x, params)
    assert jnp.allclose(out, ref, atol=2e-2, rtol=2e-2), \
        float(jnp.max(jnp.abs(out - ref)))

    # Also exercise the multi-step ("parallel") grid path used for larger batches.
    big = 272                      # > _ONE_STEP_MAX -> 2 grid steps, 2 TCs on v7x
    xb = jax.random.normal(jax.random.PRNGKey(1), (big, input_length), jnp.float32)
    outb = yoga_classifier_forward(xb, params, num_classes=num_classes)
    jax.block_until_ready(outb)
    assert outb.shape == (big, num_classes)
    refb = _reference_forward(xb, params)
    assert jnp.allclose(outb, refb, atol=2e-2, rtol=2e-2), \
        float(jnp.max(jnp.abs(outb - refb)))

    print("KERNEL_OK")
</pallas_src>

<mosaic_0001>
module attributes {stable_mosaic.version = 11 : i64} {
  func.func @_mlp_kernel(%arg0: i32, %arg1: memref<16x32xbf16, #tpu.memory_space<vmem>>, %arg2: memref<32x128xbf16, #tpu.memory_space<vmem>>, %arg3: memref<2x128xbf16, #tpu.memory_space<vmem>>, %arg4: memref<128x128xbf16, #tpu.memory_space<vmem>>, %arg5: memref<128x128xbf16, #tpu.memory_space<vmem>>, %arg6: memref<1x128xbf16, #tpu.memory_space<vmem>>, %arg7: memref<16x128xbf16, #tpu.memory_space<vmem>>) attributes {dimension_semantics = [#tpu.dimension_semantics<parallel>], iteration_bounds = array<i64: 1>, scalar_prefetch = 0 : i64, scratch_operands = 0 : i64, tpu.core_type = #tpu.core_type<tc>, window_params = [{transform_indices = @transform_0, window_bounds = array<i64: 16, 32>}, {pipeline_mode = #tpu.pipeline_mode<synchronous>, transform_indices = @transform_1, window_bounds = array<i64: 32, 128>}, {pipeline_mode = #tpu.pipeline_mode<synchronous>, transform_indices = @transform_2, window_bounds = array<i64: 2, 128>}, {pipeline_mode = #tpu.pipeline_mode<synchronous>, transform_indices = @transform_3, window_bounds = array<i64: 128, 128>}, {pipeline_mode = #tpu.pipeline_mode<synchronous>, transform_indices = @transform_4, window_bounds = array<i64: 128, 128>}, {pipeline_mode = #tpu.pipeline_mode<synchronous>, transform_indices = @transform_5, window_bounds = array<i64: 1, 128>}, {transform_indices = @transform_6, window_bounds = array<i64: 16, 128>}]} {
    %c0 = arith.constant 0 : index
    %c0_0 = arith.constant 0 : index
    %0 = vector.load %arg3[%c0, %c0_0] : memref<2x128xbf16, #tpu.memory_space<vmem>>, vector<2x128xbf16>
    %1 = arith.extf %0 : vector<2x128xbf16> to vector<2x128xf32>
    %c0_1 = arith.constant 0 : index
    %c0_2 = arith.constant 0 : index
    %2 = vector.load %arg1[%c0_1, %c0_2] : memref<16x32xbf16, #tpu.memory_space<vmem>>, vector<16x32xbf16>
    %c0_3 = arith.constant 0 : index
    %c0_4 = arith.constant 0 : index
    %3 = vector.load %arg2[%c0_3, %c0_4] : memref<32x128xbf16, #tpu.memory_space<vmem>>, vector<32x128xbf16>
    %cst = arith.constant dense<0.000000e+00> : vector<16x128xf32>
    %4 = tpu.matmul %2, %3, %cst {dimension_numbers = #tpu.dot_dimension_numbers<[1], [0], [0], [1], [0, 0, 1, 1], [], []>} : vector<16x32xbf16>, vector<32x128xbf16>, vector<16x128xf32> -> vector<16x128xf32>
    %5 = vector.extract_strided_slice %1 {offsets = [0, 0], sizes = [1, 128], strides = [1, 1]} : vector<2x128xf32> to vector<1x128xf32>
    %6 = vector.broadcast %5 : vector<1x128xf32> to vector<16x128xf32>
    %7 = arith.addf %4, %6 : vector<16x128xf32>
    %cst_5 = arith.constant 0.000000e+00 : f32
    %8 = vector.broadcast %cst_5 : f32 to vector<16x128xf32>
    %9 = arith.maximumf %7, %8 : vector<16x128xf32>
    %10 = arith.truncf %9 : vector<16x128xf32> to vector<16x128xbf16>
    %c0_6 = arith.constant 0 : index
    %c0_7 = arith.constant 0 : index
    %11 = vector.load %arg4[%c0_6, %c0_7] : memref<128x128xbf16, #tpu.memory_space<vmem>>, vector<128x128xbf16>
    %cst_8 = arith.constant dense<0.000000e+00> : vector<16x128xf32>
    %12 = tpu.matmul %10, %11, %cst_8 {dimension_numbers = #tpu.dot_dimension_numbers<[1], [0], [0], [1], [0, 0, 1, 1], [], []>} : vector<16x128xbf16>, vector<128x128xbf16>, vector<16x128xf32> -> vector<16x128xf32>
    %13 = vector.extract_strided_slice %1 {offsets = [1, 0], sizes = [1, 128], strides = [1, 1]} : vector<2x128xf32> to vector<1x128xf32>
    %14 = vector.broadcast %13 : vector<1x128xf32> to vector<16x128xf32>
    %15 = arith.addf %12, %14 : vector<16x128xf32>
    %cst_9 = arith.constant 0.000000e+00 : f32
    %16 = vector.broadcast %cst_9 : f32 to vector<16x128xf32>
    %17 = arith.maximumf %15, %16 : vector<16x128xf32>
    %18 = arith.truncf %17 : vector<16x128xf32> to vector<16x128xbf16>
    %c0_10 = arith.constant 0 : index
    %c0_11 = arith.constant 0 : index
    %19 = vector.load %arg5[%c0_10, %c0_11] : memref<128x128xbf16, #tpu.memory_space<vmem>>, vector<128x128xbf16>
    %cst_12 = arith.constant dense<0.000000e+00> : vector<16x128xf32>
    %20 = tpu.matmul %18, %19, %cst_12 {dimension_numbers = #tpu.dot_dimension_numbers<[1], [0], [0], [1], [0, 0, 1, 1], [], []>} : vector<16x128xbf16>, vector<128x128xbf16>, vector<16x128xf32> -> vector<16x128xf32>
    %c0_13 = arith.constant 0 : index
    %c0_14 = arith.constant 0 : index
    %21 = vector.load %arg6[%c0_13, %c0_14] : memref<1x128xbf16, #tpu.memory_space<vmem>>, vector<1x128xbf16>
    %22 = arith.extf %21 : vector<1x128xbf16> to vector<1x128xf32>
    %23 = vector.broadcast %22 : vector<1x128xf32> to vector<16x128xf32>
    %24 = arith.addf %20, %23 : vector<16x128xf32>
    %25 = arith.truncf %24 : vector<16x128xf32> to vector<16x128xbf16>
    %c0_15 = arith.constant 0 : index
    %c0_16 = arith.constant 0 : index
    %26 = vector.load %arg7[%c0_15, %c0_16] : memref<16x128xbf16, #tpu.memory_space<vmem>>, vector<16x128xbf16>
    tpu.vector_store %arg7[%c0_15, %c0_16], %25 {strides = array<i32>} : memref<16x128xbf16, #tpu.memory_space<vmem>>, vector<16x128xbf16>,
    return
  }
  func.func @transform_0(%arg0: i32) -> (i32, i32) {
    %c0_i32 = arith.constant 0 : i32
    %c0_i32_0 = arith.constant 0 : i32
    return %arg0, %c0_i32 : i32, i32
  }
  func.func @transform_1(%arg0: i32) -> (i32, i32) {
    %c0_i32 = arith.constant 0 : i32
    %c0_i32_0 = arith.constant 0 : i32
    %c0_i32_1 = arith.constant 0 : i32
    return %c0_i32, %c0_i32_0 : i32, i32
  }
  func.func @transform_2(%arg0: i32) -> (i32, i32) {
    %c0_i32 = arith.constant 0 : i32
    %c0_i32_0 = arith.constant 0 : i32
    %c0_i32_1 = arith.constant 0 : i32
    return %c0_i32, %c0_i32_0 : i32, i32
  }
  func.func @transform_3(%arg0: i32) -> (i32, i32) {
    %c0_i32 = arith.constant 0 : i32
    %c0_i32_0 = arith.constant 0 : i32
    %c0_i32_1 = arith.constant 0 : i32
    return %c0_i32, %c0_i32_0 : i32, i32
  }
  func.func @transform_4(%arg0: i32) -> (i32, i32) {
    %c0_i32 = arith.constant 0 : i32
    %c0_i32_0 = arith.constant 0 : i32
    %c0_i32_1 = arith.constant 0 : i32
    return %c0_i32, %c0_i32_0 : i32, i32
  }
  func.func @transform_5(%arg0: i32) -> (i32, i32) {
    %c0_i32 = arith.constant 0 : i32
    %c0_i32_0 = arith.constant 0 : i32
    %c0_i32_1 = arith.constant 0 : i32
    return %c0_i32, %c0_i32_0 : i32, i32
  }
  func.func @transform_6(%arg0: i32) -> (i32, i32) {
    %c0_i32 = arith.constant 0 : i32
    %c0_i32_0 = arith.constant 0 : i32
    return %arg0, %c0_i32 : i32, i32
  }
}

</mosaic_0001>

<bundles_post_ra>
// kernel: yoga_classifier_forward.1
= control target key start
LH: loop header
LB: loop body
LE: loop exit
PB: predicated region body
PF: predicated region fallthrough
CT: control target
= control target key end

     0   :  { %v457_v0 = vmov 0.0   ;;  %vm458_vm0 = vmmov 0   ;;  %vm53_vm1 = vcmask 261120   ;;  %v32_v18 = vlaneseq  ;;  %s584_s1 = inlined_call_operand.vmem [shape: bf16[32,128], index: 1, kind: input, shape index: {}]   ;;  %s585_s3 = inlined_call_operand.vmem [shape: bf16[128,128], index: 3, kind: input, shape index: {}]   ;;  %s586_s0 = inlined_call_operand.vmem [shape: bf16[16,32], index: 0, kind: input, shape index: {}]   ;;  %s587_s4 = inlined_call_operand.vmem [shape: bf16[128,128], index: 4, kind: input, shape index: {}]   ;;  %s588_s2 = inlined_call_operand.vmem [shape: bf16[2,128], index: 2, kind: input, shape index: {}]   ;;  %s589_s5 = inlined_call_operand.vmem [shape: bf16[1,128], index: 5, kind: input, shape index: {}]   ;;  %s590_s6 = inlined_call_operand.vmem [shape: bf16[16,128], index: 6, kind: output, shape index: {}]  }
   0x1   :  { %388 = vmatprep.subr.bf16.mxu0 %v457_v0  ;;  %v438_v1 = vld [vmem:[%s584_s1] sm:$0xff]   ;;  %392 = vmatprep.mubr.msk.bf16.mxu0 %vm458_vm0, %v457_v0  ;;  %v439_v2 = vld [vmem:[%s584_s1 + $0x8] sm:$0xff]   ;;  %v443_v6 = vld [vmem:[%s585_s3 + $0x10] sm:$0xff]  }
   0x2   :  { %396 = vmatprep.subr.bf16.mxu1 %v457_v0  ;;  %412 = vmatprep.mubr.msk.bf16.mxu1 %vm458_vm0, %v457_v0  ;;  %v441_v3 = vld [vmem:[%s585_s3] sm:$0xff]   ;;  %v442_v5 = vld [vmem:[%s585_s3 + $0x8] sm:$0xff]   ;;  %v444_v7 = vld [vmem:[%s585_s3 + $0x18] sm:$0xff]   ;;  %v33_v19 = vshrl.u32 %v32_v18, 7 }
   0x3   :  { %389 = vmatpush3.bf16.msra.mxu0 %v438_v1  ;;  %v440_v4 = vld [vmem:[%s586_s0] sm:$0xff]   ;;  %397 = vmatpush3.bf16.msra.mxu1 %v441_v3  ;;  %v446_v9 = vld [vmem:[%s585_s3 + $0x28] sm:$0xff]   ;;  %v447_v10 = vld [vmem:[%s585_s3 + $0x30] sm:$0xff]  }
   0x4   :  { %390 = vmatprep.subr.bf16.mxu0 %v457_v0  ;;  %398 = vmatprep.subr.bf16.mxu1 %v457_v0  ;;  %v445_v8 = vld [vmem:[%s585_s3 + $0x20] sm:$0xff]   ;;  %v448_v11 = vld [vmem:[%s585_s3 + $0x38] sm:$0xff]   ;;  %v450_v13 = vld [vmem:[%s587_s4 + $0x8] sm:$0xff]   ;;  %v34_v22 = vsub.s32 0, %v33_v19  ;;  %v119_v35 = vsub.s32 1, %v33_v19 }
   0x5   :  { %v449_v12 = vld [vmem:[%s587_s4] sm:$0xff]   ;;  %v451_v14 = vld [vmem:[%s587_s4 + $0x10] sm:$0xff]   ;;  %v452_v15 = vld [vmem:[%s587_s4 + $0x18] sm:$0xff]  }
   0x6   :  { %v453_v16 = vld [vmem:[%s587_s4 + $0x20] sm:$0xff]   ;;  %v454_v17 = vld [vmem:[%s587_s4 + $0x28] sm:$0xff]   ;;  %v455_v33 = vld [vmem:[%s587_s4 + $0x30] sm:$0xff]  }
   0x7   :  { %391 = vmatpush3.bf16.msra.mxu0 %v439_v2  ;;  %399 = vmatpush3.bf16.msra.mxu1 %v442_v5  ;;  %v24_v20 = vld [vmem:[%s588_s2] sm:$0x1]  ;;  %v456_v34 = vld [vmem:[%s587_s4 + $0x38] sm:$0xff]  }
   0x8   :  { %416 = vmatprep.subr.bf16.mxu0 %v457_v0  ;;  %400 = vmatprep.subr.bf16.mxu1 %v457_v0  ;;  %v25_v21 = vunpack.c.l.bf16 %v24_v20  ;;  %v229_v46 = vld [vmem:[%s589_s5] sm:$0x1] }
   0x9   :  { %v230_v47 = vunpack.c.l.bf16 %v229_v46 }
   0xa   :  { %393 = vmatmul.mubr.msk.bf16.vlgmr.msra.gmra.mrb[0].mxu0 %vm53_vm1, %v440_v4  ;;  %v35_v23 = vrot.slane %v25_v21, %v34_v22  ;;  %v120_v36 = vrot.slane %v25_v21, %v119_v35 }
   0xb   :  { %432 = vmatprep.mubr.msk.bf16.mxu0 %vm458_vm0, %v457_v0  ;;  %401 = vmatpush3.bf16.msra.mxu1 %v443_v6  ;;  %v234_v48 = vrot.slane %v230_v47, %v34_v22 }
   0xc   :  { %402 = vmatprep.subr.bf16.mxu1 %v457_v0  ;;  %417 = vmatpush3.bf16.msra.mxu0 %v449_v12 }
   0xd   :  { %418 = vmatprep.subr.bf16.mxu0 %v457_v0 }
   0xf   :  { %403 = vmatpush3.bf16.msra.mxu1 %v444_v7 }
  0x10   :  { %404 = vmatprep.subr.bf16.mxu1 %v457_v0  ;;  %419 = vmatpush3.bf16.msra.mxu0 %v450_v13 }
  0x11   :  { %420 = vmatprep.subr.bf16.mxu0 %v457_v0 }
  0x13   :  { %405 = vmatpush3.bf16.msra.mxu1 %v445_v8 }
  0x14   :  { %406 = vmatprep.subr.bf16.mxu1 %v457_v0  ;;  %421 = vmatpush3.bf16.msra.mxu0 %v451_v14 }
  0x15   :  { %422 = vmatprep.subr.bf16.mxu0 %v457_v0 }
  0x17   :  { %407 = vmatpush3.bf16.msra.mxu1 %v446_v9 }
  0x18   :  { %408 = vmatprep.subr.bf16.mxu1 %v457_v0  ;;  %423 = vmatpush3.bf16.msra.mxu0 %v452_v15 }
  0x19   :  { %424 = vmatprep.subr.bf16.mxu0 %v457_v0 }
  0x1b   :  { %409 = vmatpush3.bf16.msra.mxu1 %v447_v10 }
  0x1c   :  { %410 = vmatprep.subr.bf16.mxu1 %v457_v0  ;;  %425 = vmatpush3.bf16.msra.mxu0 %v453_v16 }
  0x1d   :  { %426 = vmatprep.subr.bf16.mxu0 %v457_v0 }
  0x1f   :  { %411 = vmatpush3.bf16.msra.mxu1 %v448_v11 }
  0x20   :  { %427 = vmatpush3.bf16.msra.mxu0 %v454_v17 }
  0x21   :  { %428 = vmatprep.subr.bf16.mxu0 %v457_v0 }
  0x24   :  { %429 = vmatpush3.bf16.msra.mxu0 %v455_v33 }
  0x25   :  { %430 = vmatprep.subr.bf16.mxu0 %v457_v0 }
  0x28   :  { %431 = vmatpush3.bf16.msra.mxu0 %v456_v34 }
  0xdd   :  { %v91_v24 = vpop.f32.mrb[0].mxu0 }
  0xde   :  { %v92_v25 = vadd.f32 %v91_v24, %v35_v23  ;;  %v394_v26 = vpop.f32.mrb[1].mxu0 }
  0xdf   :  { %v94_v27 = vpop.f32.mrb[2].mxu0 }
  0xe0   :  { %v95_v28 = vadd.f32 %v94_v27, %v35_v23  ;;  %v395_v29 = vpop.f32.mrb[3].mxu0  ;;  %v98_v30 = vmax.f32 %v92_v25, 0.0 }
  0xe2   :  { %v99_v31 = vmax.f32 %v95_v28, 0.0 }
  0xe4   :  { %v100_v32 = vpack.c.bf16 %v99_v31, %v98_v30 }
  0xe6   :  { %413 = vmatmul.mubr.bf16.vlgmr.msra.gmra.mrb[0].mxu1 %v100_v32 }
 0x1b9   :  { %v203_v37 = vpop.f32.mrb[0].mxu1 }
 0x1ba   :  { %v204_v38 = vadd.f32 %v203_v37, %v120_v36  ;;  %v414_v39 = vpop.f32.mrb[1].mxu1 }
 0x1bb   :  { %v206_v40 = vpop.f32.mrb[2].mxu1 }
 0x1bc   :  { %v207_v41 = vadd.f32 %v206_v40, %v120_v36  ;;  %v415_v42 = vpop.f32.mrb[3].mxu1  ;;  %v210_v43 = vmax.f32 %v204_v38, 0.0 }
 0x1be   :  { %v211_v44 = vmax.f32 %v207_v41, 0.0 }
 0x1c0   :  { %v212_v45 = vpack.c.bf16 %v211_v44, %v210_v43 }
 0x1c2   :  { %433 = vmatmul.mubr.bf16.vlgmr.msra.gmra.mrb[4].mxu0 %v212_v45 }
 0x295   :  { %v317_v49 = vpop.f32.mrb[4].mxu0 }
 0x296   :  { %v434_v50 = vpop.f32.mrb[5].mxu0  ;;  %v318_v52 = vadd.f32 %v317_v49, %v234_v48 }
 0x297   :  { %v320_v51 = vpop.f32.mrb[6].mxu0 }
 0x298   :  { %v321_v53 = vadd.f32 %v320_v51, %v234_v48  ;;  %v435_v54 = vpop.f32.mrb[7].mxu0 }
 0x29a   :  { %v365_v55 = vpack.c.bf16 %v321_v53, %v318_v52 }
 0x29c   :  { %366 = vst [vmem:[%s590_s6] sm:$0xff] %v365_v55  }

</bundles_post_ra>
